<compile_context>
chip_gen: v6e
topology: v6e:2x2x1
jax: 0.10.0
libtpu: 0.0.40
codegen_flags: <defaults>
</compile_context>

<pallas_src>
import jax
import jax.numpy as jnp
from jax.experimental import pallas as pl
from jax.experimental.pallas import tpu as pltpu


def gated_attention_kernel(x_ref, w_ref, b_ref, o_ref):
    TB, N, D = x_ref.shape

    x = x_ref[...]                                   # (TB, N, D), native dtype

    # Fused attention+gate projection on the MXU; contract D (last dim of both
    # operands) so the result is lane-dense: (TB, 2, N) with N on the lane axis.
    w_b = jnp.broadcast_to(w_ref[...], (TB,) + w_ref.shape)       # (TB, 2, D), tiny
    s_t = jnp.einsum("bcd,bnd->bcn", w_b, x,
                     preferred_element_type=jnp.float32)          # (TB, 2, N) f32

    a = jnp.tanh(s_t[:, 0:1, :] + b_ref[0])          # (TB, 1, N)
    g = jax.nn.sigmoid(s_t[:, 1:2, :] + b_ref[1])    # (TB, 1, N)
    s = a * g                                        # (TB, 1, N) f32

    # Softmax over the sequence axis (lane axis -> dense XLU reduces).
    m = jnp.max(s, axis=2, keepdims=True)            # (TB, 1, 1)
    e = jnp.exp(s - m)                               # (TB, 1, N)
    denom = jnp.sum(e, axis=2, keepdims=True)        # (TB, 1, 1)

    # Dropout(p=0.0) is identity -> skip.
    # Unnormalized weighted sum over the sequence on the MXU with f32
    # accumulation; the softmax normalization is folded into one (TB, 1, D)
    # rescale instead of an N-length multiply.
    ctx = jnp.einsum("bqn,bnd->bqd", e.astype(x.dtype), x,
                     preferred_element_type=jnp.float32)          # (TB, 1, D) f32
    inv = pl.reciprocal(denom, approx=False)         # exact: keeps 1e-5 tolerance
    o_ref[...] = (ctx * inv).astype(o_ref.dtype)


def _vmem_capacity_bytes():
    """Physical VMEM per TensorCore, with a conservative fallback."""
    try:
        cap = int(getattr(pltpu.get_tpu_info(), "vmem_capacity_bytes", 0))
        if cap > 0:
            return cap
    except Exception:
        pass
    return 64 * 1024 * 1024   # v7x per-TC size: safe lower bound everywhere


def _pick_batch_block(B, N, D, itemsize, budget_bytes):
    """Batch elements per grid step: largest block whose x slab fits the
    per-buffer budget, preferring >= 4 grid steps (>= 2 pipelined steps per
    v7x TensorCore; ~0.35 us/step makes extra steps cheap)."""
    per_elem = max(1, N * D * itemsize)
    cap = max(1, budget_bytes // per_elem)
    steps = max(pl.cdiv(B, cap), min(4, B))
    return max(1, pl.cdiv(B, steps))


def gated_attention(x, w_att, b_att, w_gate, b_gate):
    """x: (B, N, D); w_*: (D, 1); b_*: (1, 1). Returns context vector (B, 1, D)."""
    B, N, D = x.shape
    # Fuse the two width-1 projections into one (2, D) weight (row 0 = attention,
    # row 1 = gate); biases go to SMEM as two f32 scalars.
    w_cat = jnp.stack([w_att[:, 0], w_gate[:, 0]], axis=0).astype(x.dtype)                 # (2, D)
    b_cat = jnp.concatenate([b_att.reshape(-1), b_gate.reshape(-1)]).astype(jnp.float32)   # (2,)

    # Size blocks / VMEM limit from the actual chip generation:
    #   v5e/v6e (128 MiB phys) -> 64 MiB limit, ~16 MiB x blocks
    #   v7x     (64 MiB phys)  -> 32 MiB limit, ~8 MiB x blocks
    vmem_cap = _vmem_capacity_bytes()
    vmem_limit = max(32 * 1024 * 1024, min(64 * 1024 * 1024, vmem_cap // 2))
    budget = max(2 * 1024 * 1024, vmem_limit // 4)   # per x block (double-buffered)

    tb = _pick_batch_block(B, N, D, x.dtype.itemsize, budget)
    grid = pl.cdiv(B, tb)
    b_pad = grid * tb
    # Zero-padded tail block: keeps full-size DMAs/stores for awkward batch sizes.
    x_in = x if b_pad == B else jnp.pad(x, ((0, b_pad - B), (0, 0), (0, 0)))

    out = pl.pallas_call(
        gated_attention_kernel,
        out_shape=jax.ShapeDtypeStruct((b_pad, 1, D), x.dtype),
        grid_spec=pltpu.PrefetchScalarGridSpec(
            num_scalar_prefetch=0,
            grid=(grid,),
            in_specs=[
                pl.BlockSpec((tb, N, D), lambda b: (b, 0, 0)),      # x: TB batch elems
                pl.BlockSpec((2, D), lambda b: (0, 0)),             # fused (2, D) weights
                pl.BlockSpec(memory_space=pltpu.MemorySpace.SMEM),  # fused biases (scalars)
            ],
            out_specs=pl.BlockSpec((tb, 1, D), lambda b: (b, 0, 0)),
        ),
        compiler_params=pltpu.CompilerParams(
            dimension_semantics=("parallel",),
            vmem_limit_bytes=vmem_limit,
        ),
    )(x_in, w_cat, b_cat)
    return out if b_pad == B else out[:B]


def gated_attention_ref(x, w_att, b_att, w_gate, b_gate):
    """Pure-JAX reference mirroring the PyTorch forward."""
    a = jnp.tanh(jnp.einsum("bnd,do->bno", x, w_att) + b_att[0, 0])
    g = jax.nn.sigmoid(jnp.einsum("bnd,do->bno", x, w_gate) + b_gate[0, 0])
    s = a * g
    w = jax.nn.softmax(s, axis=1)
    return jnp.einsum("bno,bnd->bod", w, x)


if __name__ == "__main__":
    key = jax.random.PRNGKey(0)
    B, N, D = 2, 8, 32  # batch, seq, hidden

    k_x, k_wa, k_ba, k_wg, k_bg = jax.random.split(key, 5)
    bound = 1.0 / (D ** 0.5)  # matches nn.Linear default init range

    x = jax.random.normal(k_x, (B, N, D), dtype=jnp.float32)
    # PyTorch Linear(dim, 1): weight (1, D), bias (1,). Stored here as (D, 1) / (1, 1).
    w_att = jax.random.uniform(k_wa, (D, 1), minval=-bound, maxval=bound, dtype=jnp.float32)
    b_att = jax.random.uniform(k_ba, (1, 1), minval=-bound, maxval=bound, dtype=jnp.float32)
    w_gate = jax.random.uniform(k_wg, (D, 1), minval=-bound, maxval=bound, dtype=jnp.float32)
    b_gate = jax.random.uniform(k_bg, (1, 1), minval=-bound, maxval=bound, dtype=jnp.float32)

    out = gated_attention(x, w_att, b_att, w_gate, b_gate)
    out = jax.block_until_ready(out)

    ref = gated_attention_ref(x, w_att, b_att, w_gate, b_gate)
    assert out.shape == (B, 1, D)
    assert jnp.allclose(out, ref, atol=1e-5, rtol=1e-5), "mismatch vs JAX reference"

    print("KERNEL_OK")
</pallas_src>

<mosaic_0001>
module attributes {stable_mosaic.version = 11 : i64} {
  func.func @gated_attention_kernel(%arg0: i32, %arg1: memref<1x8x32xf32, #tpu.memory_space<vmem>>, %arg2: memref<2x32xf32, #tpu.memory_space<vmem>>, %arg3: memref<2xf32, #tpu.memory_space<smem>>, %arg4: memref<1x1x32xf32, #tpu.memory_space<vmem>>) attributes {dimension_semantics = [#tpu.dimension_semantics<parallel>], iteration_bounds = array<i64: 2>, scalar_prefetch = 0 : i64, scratch_operands = 0 : i64, tpu.core_type = #tpu.core_type<tc>, window_params = [{transform_indices = @transform_0, window_bounds = array<i64: 1, 8, 32>}, {pipeline_mode = #tpu.pipeline_mode<synchronous>, transform_indices = @transform_1, window_bounds = array<i64: 2, 32>}, {transform_indices = @transform_2, window_bounds = array<i64: 2>}, {transform_indices = @transform_3, window_bounds = array<i64: 1, 1, 32>}]} {
    %c0 = arith.constant 0 : index
    %c0_0 = arith.constant 0 : index
    %c0_1 = arith.constant 0 : index
    %0 = vector.load %arg1[%c0, %c0_0, %c0_1] : memref<1x8x32xf32, #tpu.memory_space<vmem>>, vector<1x8x32xf32>
    %c0_2 = arith.constant 0 : index
    %c0_3 = arith.constant 0 : index
    %1 = vector.load %arg2[%c0_2, %c0_3] : memref<2x32xf32, #tpu.memory_space<vmem>>, vector<2x32xf32>
    %2 = vector.shape_cast %1 : vector<2x32xf32> to vector<1x2x32xf32>
    "tpu.trace_start"() <{level = 10 : i32, message = "bcd,bnd->bcn"}> : () -> ()
    %cst = arith.constant dense<0.000000e+00> : vector<1x2x8xf32>
    %3 = tpu.matmul %2, %0, %cst {dimension_numbers = #tpu.dot_dimension_numbers<[2], [2], [1], [1], [0, 0, 0, 1, 1, 1], [0], [0]>} : vector<1x2x32xf32>, vector<1x8x32xf32>, vector<1x2x8xf32> -> vector<1x2x8xf32>
    "tpu.trace_stop"() : () -> ()
    %4 = vector.extract_strided_slice %3 {offsets = [0, 0, 0], sizes = [1, 1, 8], strides = [1, 1, 1]} : vector<1x2x8xf32> to vector<1x1x8xf32>
    %c0_4 = arith.constant 0 : index
    %5 = memref.load %arg3[%c0_4] : memref<2xf32, #tpu.memory_space<smem>>
    %6 = vector.broadcast %5 : f32 to vector<1x1x8xf32>
    %7 = arith.addf %4, %6 : vector<1x1x8xf32>
    %8 = math.tanh %7 : vector<1x1x8xf32>
    %9 = vector.extract_strided_slice %3 {offsets = [0, 1, 0], sizes = [1, 1, 8], strides = [1, 1, 1]} : vector<1x2x8xf32> to vector<1x1x8xf32>
    %c1 = arith.constant 1 : index
    %10 = memref.load %arg3[%c1] : memref<2xf32, #tpu.memory_space<smem>>
    %11 = vector.broadcast %10 : f32 to vector<1x1x8xf32>
    %12 = arith.addf %9, %11 : vector<1x1x8xf32>
    %13 = arith.negf %12 : vector<1x1x8xf32>
    %14 = math.exp %13 : vector<1x1x8xf32>
    %cst_5 = arith.constant 1.000000e+00 : f32
    %15 = vector.broadcast %cst_5 : f32 to vector<1x1x8xf32>
    %16 = arith.addf %15, %14 : vector<1x1x8xf32>
    %17 = arith.divf %15, %16 : vector<1x1x8xf32>
    %18 = arith.mulf %8, %17 : vector<1x1x8xf32>
    %cst_6 = arith.constant dense<0xFF800000> : vector<1x1xf32>
    %19 = vector.multi_reduction <maximumf>, %18, %cst_6 [2] : vector<1x1x8xf32> to vector<1x1xf32>
    %20 = vector.shape_cast %19 : vector<1x1xf32> to vector<1x1x1xf32>
    %21 = vector.broadcast %20 : vector<1x1x1xf32> to vector<1x1x8xf32>
    %22 = arith.subf %18, %21 : vector<1x1x8xf32>
    %23 = math.exp %22 : vector<1x1x8xf32>
    %cst_7 = arith.constant dense<0.000000e+00> : vector<1x1xf32>
    %24 = vector.multi_reduction <add>, %23, %cst_7 [2] : vector<1x1x8xf32> to vector<1x1xf32>
    %25 = vector.shape_cast %24 : vector<1x1xf32> to vector<1x1x1xf32>
    "tpu.trace_start"() <{level = 10 : i32, message = "bqn,bnd->bqd"}> : () -> ()
    %cst_8 = arith.constant dense<0.000000e+00> : vector<1x1x32xf32>
    %26 = tpu.matmul %23, %0, %cst_8 {dimension_numbers = #tpu.dot_dimension_numbers<[2], [1], [1], [2], [0, 0, 0, 1, 1, 2], [0], [0]>} : vector<1x1x8xf32>, vector<1x8x32xf32>, vector<1x1x32xf32> -> vector<1x1x32xf32>
    "tpu.trace_stop"() : () -> ()
    %27 = tpu.reciprocal %25 : vector<1x1x1xf32> -> vector<1x1x1xf32>
    %28 = vector.broadcast %27 : vector<1x1x1xf32> to vector<1x1x32xf32>
    %29 = arith.mulf %26, %28 : vector<1x1x32xf32>
    %c0_9 = arith.constant 0 : index
    %c0_10 = arith.constant 0 : index
    %c0_11 = arith.constant 0 : index
    %30 = vector.load %arg4[%c0_9, %c0_10, %c0_11] : memref<1x1x32xf32, #tpu.memory_space<vmem>>, vector<1x1x32xf32>
    tpu.vector_store %arg4[%c0_9, %c0_10, %c0_11], %29 {strides = array<i32>} : memref<1x1x32xf32, #tpu.memory_space<vmem>>, vector<1x1x32xf32>,
    return
  }
  func.func @transform_0(%arg0: i32) -> (i32, i32, i32) {
    %c0_i32 = arith.constant 0 : i32
    %c0_i32_0 = arith.constant 0 : i32
    %c0_i32_1 = arith.constant 0 : i32
    return %arg0, %c0_i32, %c0_i32_0 : i32, i32, i32
  }
  func.func @transform_1(%arg0: i32) -> (i32, i32) {
    %c0_i32 = arith.constant 0 : i32
    %c0_i32_0 = arith.constant 0 : i32
    %c0_i32_1 = arith.constant 0 : i32
    return %c0_i32, %c0_i32_0 : i32, i32
  }
  func.func @transform_2(%arg0: i32) -> i32 {
    %c0_i32 = arith.constant 0 : i32
    %c0_i32_0 = arith.constant 0 : i32
    return %c0_i32 : i32
  }
  func.func @transform_3(%arg0: i32) -> (i32, i32, i32) {
    %c0_i32 = arith.constant 0 : i32
    %c0_i32_0 = arith.constant 0 : i32
    %c0_i32_1 = arith.constant 0 : i32
    return %arg0, %c0_i32, %c0_i32_0 : i32, i32, i32
  }
}

</mosaic_0001>

<bundles_post_ra>
// kernel: tpu_custom_call.1
= control target key start
LH: loop header
LB: loop body
LE: loop exit
PB: predicated region body
PF: predicated region fallthrough
CT: control target
= control target key end

     0   :  { %8 = vsyncpa [#allocation3], 0  ;;  %s954_s0 = inlined_call_operand.hbm [shape: f32[2,8,32], index: 0, kind: input, shape index: {}]   ;;  %s955_s1 = inlined_call_operand.hbm [shape: f32[2,32], index: 1, kind: input, shape index: {}]   ;;  %s956_s2 = inlined_call_operand.vmem [shape: f32[2], index: 2, kind: input, shape index: {}]   ;;  %s957_s3 = inlined_call_operand.hbm [shape: f32[2,1,32], index: 3, kind: output, shape index: {}]  }
   0x1   :  { %10 = vsyncpa [#allocation3 + $0x1], 0 }
   0x2   :  { %11 = vsyncpa [#allocation7], 0 }
   0x3   :  { %12 = vsyncpa [#allocation5], 0 }
   0x4   :  { %13 = vsyncpa [#allocation4], 0 }
   0x5   :  { %15 = vsyncpa [#allocation4 + $0x1], 0  ;;  %s778_s12 = smov 0   ;;  %s780_s13 = smov 0  }
   0x6   :  { %s782_s14 = smov 0   ;;  %s784_s15 = smov 0  }
   0x7 LB: > { %s799_s16 = sadd.s32 4294967295, %s750_s15   ;;  %s497_s17 = sadd.s32 4294967294, %s750_s15   ;;  %s750_s15 = sphi %s784_s15, %s981_s15   ;;  %s746_s14 = sphi %s782_s14, %s980_s14   ;;  %s742_s13 = sphi %s780_s13, %s979_s13   ;;  %s738_s12 = sphi %s778_s12, %s978_s12  }
   0x8   : > { %p41_p0 = scmp.ne.s32.totalorder %s742_s13, %s738_s12  ;;  %p958_p1 = scmp.eq.s32.totalorder %s799_s16, 0 }
   0x9   : > { %p113_p3 = scmp.eq.s32.totalorder %s497_s17, 1  ;;  %p498_p5 = scmp.ge.s32.totalorder %s750_s15, 1 }
   0xa   : > { %p808_p4 = por %p958_p1, %p41_p0  ;;  %p120_p7 = scmp.lt.s32.totalorder %s750_s15, 3 }
   0xb   : > { %p813_p6 = por %p113_p3, %p41_p0  ;;  %s752_s21 = smov [#allocation6]  }
   0xc   : > { %s962_s18 = scalar_select %p808_p4, 1, 0 }
   0xd   : > { %s963_s19 = scalar_select %p813_p6, 1, 0 }
   0xe   : > { %p818_p8 = pnand %p498_p5, %p120_p7  ;;  %s133_s22 = sshll.u32 %s752_s21, 4  ;;  %s134_s22 = int_to_ptr.vmem [resolvable:$true] %s133_s22 }
   0xf   : > { %s144_s25 = sshll.u32 %s956_s2, 4  ;;  %s835_s27 = sadd.s32 1, %s750_s15   ;;  %s145_s25 = int_to_ptr.vmem [resolvable:$true] %s144_s25 }
  0x10   : > { %s964_s20 = scalar_select %p818_p8, 1, 0 }
  0x11   : > { %p542_p10 = pneg %p818_p8  ;;  %s25_s28 = ssub.s32 %s750_s15, %s835_s27 }
  0x12   : > { %s620_s29 = scalar_lea.vmem %s134_s22, 32  ;;  %p628_p5 = scmp.lt.s32.totalorder %s134_s22, %s134_s22 }
  0x13   : > { %p830_p11 = pnand %p542_p10, %p958_p1  ;;  %p621_p13 = scmp.ne.s32.totalorder %s134_s22, %s620_s29 }
  0x14   : > { %p629_p7 = scmp.lt.s32.totalorder %s620_s29, %s620_s29 }
  0x15   : > { %p611_p12 = pneg %p830_p11 }
  0x16   : > { %p630_p10 = por %p629_p7, %p628_p5 }
  0x17   : > { %p623_p0 = pnand %p621_p13, %p611_p12 }
  0x19   : > { %p624_p3 = pneg %p623_p0 }
  0x1b   : > { %p631_p9 = pnand %p630_p10, %p624_p3 }
  0x1d   : > { %634 = shalt.err (!%p631_p9)
}
  0x1e   : > { %545 = dma.hbm_to_vmem [thread:$0]  (!%p830_p11), %s955_s1, 32, %s134_s22, [#allocation7]  }
  0x1f   : > { %s635_s5 = scalar_lea.vmem %s145_s25, 16  ;;  %p643_p13 = scmp.lt.s32.totalorder %s145_s25, %s145_s25 }
  0x20   : > { %p636_p1 = scmp.ne.s32.totalorder %s145_s25, %s635_s5  ;;  %p644_p0 = scmp.lt.s32.totalorder %s635_s5, %s635_s5 }
  0x22   : > { %p638_p2 = pnand %p636_p1, %p611_p12  ;;  %p645_p4 = por %p644_p0, %p643_p13 }
  0x24   : > { %p639_p6 = pneg %p638_p2 }
  0x26   : > { %p646_p8 = pnand %p645_p4, %p639_p6 }
  0x28   : > { %649 = shalt.err (!%p646_p8)
}
  0x29   : > { %s753_s6 = smov [#allocation8]   ;;  %p26_p1 = scmp.eq.s32.totalorder %s25_s28, 0 }
  0x2a   : > { %548 = dma.vmem_to_smem (!%p830_p11), %s145_s25, 16, %s753_s6, [#allocation5]  }
  0x2b   : > { %s28_s7 = sadd.s32 1, %s746_s14  ;;  %p35_p2 = scmp.ne.s32.totalorder %s746_s14, %s742_s13 }
  0x2c   : > { %p36_p9 = scmp.eq.s32.totalorder %s750_s15, 0  ;;  %p966_p6 = scmp.eq.s32.totalorder %s799_s16, 1 }
  0x2d   : > { %s859_s8 = scalar_select %p26_p1, %s746_s14, %s28_s7  }
  0x2e   : > { %p37_p4 = por %p36_p9, %p35_p2  ;;  %p863_p8 = por %p966_p6, %p35_p2 }
  0x2f   : > { %p559_p12 = scmp.lt.s32.totalorder %s750_s15, 2  ;;  %s155_s10 = sand.u32 1, %s746_s14  }
  0x30   : > { %s967_s9 = scalar_select %p863_p8, 1, 0 }
  0x31   : > { %s502_s11 = sshll.u32 %s155_s10, 3  ;;  %s503_s17 = sshll.u32 %s750_s15, 7 }
  0x32   : > { %s873_s23 = scalar_lea.hbm %s954_s0, %s503_s17  ;;  %s159_s24 = scalar_lea.vmem [#allocation2], %s502_s11 }
  0x33   : > { %s166_s25 = sshll.u32 %s159_s24, 4  ;;  %p875_p11 = pnand %p559_p12, %p37_p4  ;;  %s167_s25 = int_to_ptr.vmem [resolvable:$true] %s166_s25 }
  0x34   : > { %s156_s28 = scalar_lea.sflag [#allocation3], %s155_s10  ;;  %s650_s29 = scalar_lea.hbm %s873_s23, 128 }
  0x35   : > { %p651_p3 = scmp.ne.s32.totalorder %s873_s23, %s650_s29  ;;  %p652_p5 = pneg %p875_p11 }
  0x36   : > { %s655_s5 = scalar_lea.hbm %s954_s0, 256  ;;  %p656_p13 = scmp.lt.s32.totalorder %s873_s23, %s954_s0 }
  0x37   : > { %p653_p7 = pnand %p652_p5, %p651_p3  ;;  %p657_p0 = scmp.lt.s32.totalorder %s655_s5, %s650_s29 }
  0x39   : > { %p654_p10 = pneg %p653_p7  ;;  %p658_p1 = por %p657_p0, %p656_p13 }
  0x3b   : > { %p659_p2 = pnand %p658_p1, %p654_p10 }
  0x3d   : > { %662 = shalt.err (!%p659_p2)
}
  0x3e   : > { %s663_s11 = scalar_lea.vmem %s167_s25, 128  ;;  %s754_s10 = smov [#allocation2]  }
  0x3f   : > { %p664_p9 = scmp.ne.s32.totalorder %s167_s25, %s663_s11  ;;  %s668_s17 = sshll.u32 %s754_s10, 4  ;;  %s669_s17 = int_to_ptr.vmem [resolvable:$false] %s668_s17 }
  0x40   : > { %s670_s21 = scalar_lea.vmem %s669_s17, 256  ;;  %p671_p12 = scmp.lt.s32.totalorder %s167_s25, %s669_s17 }
  0x41   : > { %p666_p4 = pnand %p664_p9, %p652_p5  ;;  %p672_p3 = scmp.lt.s32.totalorder %s670_s21, %s663_s11 }
  0x43   : > { %p667_p6 = pneg %p666_p4  ;;  %p673_p7 = por %p672_p3, %p671_p12 }
  0x45   : > { %p674_p8 = pnand %p673_p7, %p667_p6 }
  0x47   : > { %677 = shalt.err (!%p674_p8)
}
  0x48   : > { %552 = dma.hbm_to_vmem [thread:$0]  (!%p875_p11), %s873_s23, 128, %s167_s25, %s156_s28  }
  0x49   : > { %p969_p10 = scmp.ne.s32.totalorder %s964_s20, 0 }
  0x4a   : > { %s896_s22 = sand.u32 (!%p969_p10), 1, %s742_s13   ;;  %p970_p5 = scmp.ne.s32.totalorder (!%p969_p10), %s962_s18, 0 }
  0x4b   : > { %175 = sbr.rel (%p969_p10) target bundleno = 691 (0x2b3), region = 32  ;;  %s505_s24 = sshll.u32 (!%p969_p10), %s896_s22, 3 }
  0x4c   : > { %s178_s29 = scalar_lea.sflag (!%p969_p10), [#allocation3], %s896_s22  ;;  %s181_s30 = scalar_lea.vmem (!%p969_p10), [#allocation2], %s505_s24 }
  0x50   : > { %721 = dma.done.wait (%p970_p5), %s178_s29, 128  }
  0x51   : > { %723 = vsyncadd (%p970_p5), %s178_s29, 4294967168  ;;  %p971_p8 = scmp.eq.s32.totalorder %s799_s16, 0 }
  0x53   : > { %725 = dma.done.wait (%p971_p8), [#allocation7], 32   ;;  %p972_p11 = pmov %p971_p8 }
  0x54   : > { %p973_p13 = pmov %p971_p8 }
  0x55   : > { %727 = vsyncadd (%p972_p11), [#allocation7], 4294967264 }
  0x56   : > { %729 = dma.done.wait (%p973_p13), [#allocation5], 16   ;;  %p974_p0 = pmov %p971_p8 }
  0x58   : > { %731 = vsyncadd (%p974_p0), [#allocation5], 4294967280 }
  0x59   : > { %194 = sfence }
  0x5a   : > { %v212_v0 = vld [vmem:[%s181_s30] sm:$0xff]  ;;  %vm214_vm0 = vcmask 261120   ;;  %v755_v1 = vmov 0.0   ;;  %vm756_vm1 = vmmov 0   ;;  %v213_v2 = vld [vmem:[#allocation6] sm:$0x3] }
  0x5b   : > { %520 = vmatprep.subr.mxu0 %v755_v1  ;;  %522 = vmatprep.mubr.msk.f32.mxu0 %vm756_vm1, %v755_v1  ;;  %s510_s18 = sld [smem:[#allocation8 + $0x1]]  ;;  %vm308_vm2 = vcmask 57344   ;;  %vm318_vm3 = vcmask 64512   ;;  %s513_s23 = sshll.u32 %s799_s16, 4  ;;  %vm394_vm4 = vcmask 253952  }
  0x5c   : > { %521 = vmatpush3.xpose.msk.msra.mxu0 %vm214_vm0, %v212_v0  ;;  %525 = vmatprep.subr.mxu1 %v755_v1  ;;  %s291_s20 = sld [smem:[#allocation8]]  ;;  %s211_s25 = scalar_lea.vmem [#allocation9], %s896_s22 }
  0x5d   : > { %526 = vmatpush3.msra.mxu1 %v212_v0  ;;  %527 = vmatprep.mubr.msk.f32.mxu1 %vm756_vm1, %v755_v1  ;;  %s409_s26 = sshll.u32 %s211_s25, 4  ;;  %s917_s5 = scalar_lea.hbm %s957_s3, %s513_s23  ;;  %s410_s26 = int_to_ptr.vmem [resolvable:$true] %s409_s26 }
  0x5e   : > { %s397_s6 = scalar_lea.sflag [#allocation4], %s896_s22  ;;  %s678_s7 = scalar_lea.vmem %s410_s26, 16 }
  0x5f   : > { %523 = vmatmul.mubr.msk.f32.vlgmr.msra.gmra.mxu0 %vm214_vm0, %v213_v2  ;;  %p679_p1 = scmp.ne.s32.totalorder %s410_s26, %s678_s7  ;;  %p975_p2 = scmp.ne.s32.totalorder %s967_s9, 0 }
  0x60   : > { %s757_s16 = smov [#allocation9]  }
  0x61   : > { %v296_v3 = vstv %s510_s18  ;;  %p680_p9 = pnand %p679_p1, %p975_p2  ;;  %s682_s11 = sshll.u32 %s757_s16, 4  ;;  %s683_s11 = int_to_ptr.vmem [resolvable:$false] %s682_s11 }
  0x62   : > { %v292_v8 = vstv %s291_s20  ;;  %s684_s10 = scalar_lea.vmem %s683_s11, 32  ;;  %p685_p6 = scmp.lt.s32.totalorder %s410_s26, %s683_s11 }
  0x63   : > { %p681_p4 = pneg %p680_p9  ;;  %p686_p12 = scmp.lt.s32.totalorder %s684_s10, %s678_s7 }
  0x65   : > { %p687_p3 = por %p686_p12, %p685_p6 }
  0x67   : > { %p688_p7 = pnand %p687_p3, %p681_p4 }
 0x11f   : > { %v287_v4 = vpop.f32.mrf.mxu0 }
 0x120   : > { %v297_v5 = vadd.f32 %v296_v3, %v287_v4  ;;  %v293_v10 = vadd.f32 %v292_v8, %v287_v4 }
 0x121   : > { %v524_v6 = vpop.f32.mrf.mxu0 }
 0x122   : > { %v511_v7 = vmul.f32 -1.442695, %v297_v5 }
 0x124   : > { %599 = vpow2.f32 %v511_v7 }
 0x131   : > { %v600_v9 = vpop.eup %599 }
 0x132   : > { %v301_v11 = vadd.f32 1.0, %v600_v9 }
 0x134   : > { %601 = vrcp.f32 %v301_v11 }
 0x135   : > { %603 = vtanh.f32 %v293_v10 }
 0x141   : > { %v602_v12 = vpop.eup %601 }
 0x142   : > { %v305_v13 = vrot.slane %v602_v12, 1  ;;  %v604_v14 = vpop.eup %603 }
 0x144   : > { %v307_v15 = vmul.f32 %v604_v14, %v305_v13 }
 0x146   : > { %v309_v16 = vsel %vm308_vm2, %v307_v15, -inf }
 0x147   : > { %310 = vmax.xlane.f32.xlu0 %v309_v16 }
 0x1d0   : > { %v311_v17 = vpop.xlane.xlu0 %310 }
 0x1d1   : > { %v312_v18 = vsub.f32 %v307_v15, %v311_v17 }
 0x1d3   : > { %v313_v19 = vmul.f32 1.442695, %v312_v18 }
 0x1d5   : > { %605 = vpow2.f32 %v313_v19 }
 0x1e2   : > { %v606_v20 = vpop.eup %605 }
 0x1e3   : > { %528 = vmatmul.mubr.msk.f32.vlgmr.msra.gmra.mxu1 %vm318_vm3, %v606_v20  ;;  %v315_v21 = vsel %vm308_vm2, %v606_v20, 0.0 }
 0x1e4   : > { %316 = vadd.xlane.f32.xlu0 %v315_v21 }
 0x26d   : > { %v317_v22 = vpop.xlane.xlu0 %316 }
 0x26e   : > { %607 = vrcp.f32 %v317_v22 }
 0x27b   : > { %v608_v23 = vpop.eup %607 }
 0x2a3   : > { %v388_v24 = vpop.f32.mrf.mxu1 }
 0x2a4   : > { %v393_v25 = vmul.f32 %v608_v23, %v388_v24 }
 0x2a5   : > { %v529_v26 = vpop.f32.mrf.mxu1 }
 0x2a6   : > { %395 = vst.msk [vmem:[%s211_s25] sm:$0x1] %vm394_vm4, %v393_v25 }
 0x2a7   : > { %691 = shalt.err (!%p688_p7)
}
 0x2a8   : > { %s692_s17 = scalar_lea.hbm %s917_s5, 16  ;;  %s696_s24 = scalar_lea.hbm %s957_s3, 32 }
 0x2a9   : > { %p693_p10 = scmp.ne.s32.totalorder %s917_s5, %s692_s17  ;;  %p697_p11 = scmp.lt.s32.totalorder %s917_s5, %s957_s3 }
 0x2aa   : > { %p698_p13 = scmp.lt.s32.totalorder %s696_s24, %s692_s17 }
 0x2ab   : > { %p694_p5 = pnand %p693_p10, %p975_p2 }
 0x2ac   : > { %p699_p0 = por %p698_p13, %p697_p11 }
 0x2ad   : > { %p695_p8 = pneg %p694_p5 }
 0x2af   : > { %p700_p1 = pnand %p699_p0, %p695_p8 }
 0x2b1   : > { %703 = shalt.err (!%p700_p1)
}
 0x2b2   : > { %540 = dma.vmem_to_hbm [thread:$0]  (%p975_p2), %s410_s26, 16, %s917_s5, %s397_s6  }
 0x2b3 PF: > { %s421_s18 = sand.u32 1, %s738_s12   ;;  %p976_p9 = scmp.ne.s32.totalorder %s963_s19, 0 }
 0x2b4   : > { %p977_p4 = scmp.ge.s32.totalorder %s750_s15, 2  ;;  %s422_s20 = scalar_lea.sflag [#allocation4], %s421_s18 }
 0x2b6   : > { %p554_p6 = pnand %p977_p4, %p976_p9 }
 0x2b8   : > { %p555_p12 = pneg %p554_p6 }
 0x2ba   : > { %733 = dma.done.wait (%p555_p12), %s422_s20, 16  }
 0x2bb   : > { %735 = vsyncadd (%p555_p12), %s422_s20, 4294967280  ;;  %p18_p3 = scmp.ge.s32.totalorder %s835_s27, 4   ;;  %s978_s12 = smov %s742_s13 }
 0x2bc   : > { %s979_s13 = smov %s746_s14  ;;  %s980_s14 = smov %s859_s8 }
 0x2bd   : > { %s981_s15 = smov %s835_s27  ;;  %20 = sbr.rel (!%p18_p3) target bundleno = 7 (0x7), region = 86 }
 0x2c2   :  { %426 = vsyncpa [#allocation3], 1 }
 0x2c3   :  { %428 = vsyncpa [#allocation3 + $0x1], 1 }
 0x2c4   :  { %429 = vsyncpa [#allocation7], 1 }
 0x2c5   :  { %430 = vsyncpa [#allocation4], 1 }
 0x2c6   :  { %432 = vsyncpa [#allocation4 + $0x1], 1 }
 0x2c7   :  { %433 = vsyncpa [#allocation5], 1 }
 0x2c8   :  { %435 = vsyncpa [#allocation5 + $0x1], 1 }

</bundles_post_ra>
